<compile_context>
chip_gen: v5e
topology: v5e:2x2
jax: 0.10.0
libtpu: 0.0.40
codegen_flags: <defaults>
</compile_context>

<pallas_src>
import math
import functools

import jax
import jax.numpy as jnp
from jax import lax
from jax.experimental import pallas as pl
from jax.experimental.pallas import tpu as pltpu


# ----------------------------------------------------------------------------
# Per-generation defaults (best effort; conservative fallback works everywhere).
# ----------------------------------------------------------------------------
@functools.lru_cache(maxsize=1)
def _tpu_defaults():
    vmem_bytes = 64 * 1024 * 1024          # conservative fallback (v7x-sized)
    try:
        vmem_bytes = int(pltpu.get_tpu_info().vmem_capacity_bytes)
    except Exception:
        pass
    if vmem_bytes >= 128 * 1024 * 1024:    # v5e / v6e: 128 MiB VMEM
        return {"tm_max": 512, "vmem_limit": 96 * 1024 * 1024}
    # v7x: 64 MiB per TensorCore -> keep tiles / scoped VMEM smaller.
    return {"tm_max": 256, "vmem_limit": 32 * 1024 * 1024}


# ----------------------------------------------------------------------------
# Kernel 1: tiled GEMM  y = x @ w  (w already transposed to (K, N)).
# Standard (M, N, K) grid with an f32 accumulator scratch (P1 + P3).
# ----------------------------------------------------------------------------
def _matmul_kernel(x_ref, w_ref, o_ref, acc_ref):
    @pl.when(pl.program_id(2) == 0)
    def _():
        acc_ref[...] = jnp.zeros_like(acc_ref)

    acc_ref[...] += jnp.dot(x_ref[...], w_ref[...],
                            preferred_element_type=jnp.float32)

    @pl.when(pl.program_id(2) == pl.num_programs(2) - 1)
    def _():
        o_ref[...] = acc_ref[...].astype(o_ref.dtype)


def pallas_matmul(x, w, out_dtype=None, *, tm_max=None, tn_max=512, tk_max=512):
    """x: (M, K), w: (K, N) -> (M, N)."""
    M, K = x.shape
    K2, N = w.shape
    assert K == K2
    out_dtype = out_dtype if out_dtype is not None else x.dtype

    cfg = _tpu_defaults()
    if tm_max is None:
        tm_max = cfg["tm_max"]
    tm = M if M <= tm_max else tm_max      # tm_max is a multiple of 8
    tn = N if N <= tn_max else tn_max      # tn_max is a multiple of 128
    tk = K if K <= tk_max else tk_max      # tk_max is a multiple of 128
    grid = (pl.cdiv(M, tm), pl.cdiv(N, tn), pl.cdiv(K, tk))

    cost = pl.CostEstimate(
        flops=2 * M * N * K,
        transcendentals=0,
        bytes_accessed=(M * K * x.dtype.itemsize + K * N * w.dtype.itemsize
                        + M * N * jnp.dtype(out_dtype).itemsize))

    return pl.pallas_call(
        _matmul_kernel,
        out_shape=jax.ShapeDtypeStruct((M, N), out_dtype),
        grid_spec=pltpu.PrefetchScalarGridSpec(
            num_scalar_prefetch=0,
            grid=grid,
            in_specs=[
                pl.BlockSpec((tm, tk), lambda i, j, k: (i, k)),
                pl.BlockSpec((tk, tn), lambda i, j, k: (k, j)),
            ],
            out_specs=pl.BlockSpec((tm, tn), lambda i, j, k: (i, j)),
            scratch_shapes=[pltpu.VMEM((tm, tn), jnp.float32)],
        ),
        compiler_params=pltpu.CompilerParams(
            dimension_semantics=("parallel", "parallel", "arbitrary"),
            vmem_limit_bytes=cfg["vmem_limit"],
        ),
        cost_estimate=cost,
    )(x, w)


# ----------------------------------------------------------------------------
# Kernel 2: per-(batch, Tq-tile) attention with all heads grouped in one step.
# q/k/v arrive as the (B, T, H) projections (1/sqrt(d) already folded into W_q);
# each head's result is written into an f32 VMEM scratch slab immediately, and
# W_o is optionally applied in the epilogue (resident (H, H) block).
# valid_lens arrives via scalar prefetch (SMEM), one int per batch element.
# ----------------------------------------------------------------------------
def _mha_attention_kernel(vl_ref, q_ref, k_ref, v_ref, *rest,
                          num_heads, fuse_wo):
    if fuse_wo:
        wo_ref, o_ref, ctx_ref = rest
    else:
        o_ref, ctx_ref = rest

    b = pl.program_id(0)
    vl = vl_ref[b]                       # valid key length for this batch elem
    q = q_ref[0]                         # (tq, H) bf16, scale pre-folded
    k = k_ref[0]                         # (Tk, H) bf16
    v = v_ref[0]                         # (Tk, H) bf16
    tq, H = q.shape
    Tk = k.shape[0]
    d = H // num_heads

    # Valid-key mask, shared by every head.
    key_idx = lax.broadcasted_iota(jnp.int32, (tq, Tk), 1)
    mask = key_idx < vl

    # TODO(synk): Tk (key-length) tiling with an online-softmax accumulator for
    # very long sequences; here the full key length is processed per step.
    for h in range(num_heads):           # static head loop; results land in scratch
        sl = slice(h * d, (h + 1) * d)

        # (tq, Tk) scores, contracting the last dims directly (no k.T).
        scores = lax.dot_general(
            q[:, sl], k[:, sl], (((1,), (1,)), ((), ())),
            preferred_element_type=jnp.float32)

        # d2l masked_softmax: invalid key positions filled with -1e6 (f32 math).
        scores = jnp.where(mask, scores, jnp.float32(-1e6))
        scores = scores - jnp.max(scores, axis=-1, keepdims=True)
        p = jnp.exp(scores)
        p = p * pl.reciprocal(jnp.sum(p, axis=-1, keepdims=True), approx=True)

        # TODO(synk): dropout on attention weights omitted (eval mode / p=0.0).
        ctx_ref[:, sl] = jnp.dot(p.astype(v.dtype), v[:, sl],
                                 preferred_element_type=jnp.float32)

    if fuse_wo:
        # Output projection fused: the (tq, H) context never leaves VMEM.
        o_ref[0] = jnp.dot(ctx_ref[...].astype(wo_ref.dtype), wo_ref[...],
                           preferred_element_type=jnp.float32).astype(o_ref.dtype)
    else:
        o_ref[0] = ctx_ref[...].astype(o_ref.dtype)


def pallas_attention(q_proj, k_proj, v_proj, valid_lens, wo, num_heads,
                     out_dtype, tq_max=256):
    """q_proj: (B, Tq, H); k_proj, v_proj: (B, Tk, H); valid_lens: (B,) int32.
    If `wo` (H, H, already transposed) is given, the output projection is fused."""
    B, Tq, H = q_proj.shape
    _, Tk, _ = k_proj.shape
    d = H // num_heads
    cfg = _tpu_defaults()
    fuse_wo = wo is not None

    tq = Tq if Tq <= tq_max else tq_max
    n_tq = pl.cdiv(Tq, tq)

    kernel = functools.partial(_mha_attention_kernel,
                               num_heads=num_heads, fuse_wo=fuse_wo)

    in_specs = [
        pl.BlockSpec((1, tq, H), lambda b, qi, vl: (b, qi, 0)),
        pl.BlockSpec((1, Tk, H), lambda b, qi, vl: (b, 0, 0)),
        pl.BlockSpec((1, Tk, H), lambda b, qi, vl: (b, 0, 0)),
    ]
    inputs = [valid_lens, q_proj, k_proj, v_proj]
    if fuse_wo:
        in_specs.append(pl.BlockSpec((H, H), lambda b, qi, vl: (0, 0)))  # resident
        inputs.append(wo)

    itemsize = q_proj.dtype.itemsize
    flops = 4 * B * num_heads * Tq * Tk * d + (2 * B * Tq * H * H if fuse_wo else 0)
    cost = pl.CostEstimate(
        flops=flops,
        transcendentals=B * num_heads * Tq * Tk,
        bytes_accessed=((B * Tq * H + 2 * B * Tk * H) * itemsize
                        + B * Tq * H * jnp.dtype(out_dtype).itemsize
                        + (H * H * itemsize if fuse_wo else 0)))

    return pl.pallas_call(
        kernel,
        out_shape=jax.ShapeDtypeStruct((B, Tq, H), out_dtype),
        grid_spec=pltpu.PrefetchScalarGridSpec(
            num_scalar_prefetch=1,
            grid=(B, n_tq),
            in_specs=in_specs,
            out_specs=pl.BlockSpec((1, tq, H), lambda b, qi, vl: (b, qi, 0)),
            scratch_shapes=[pltpu.VMEM((tq, H), jnp.float32)],
        ),
        compiler_params=pltpu.CompilerParams(
            dimension_semantics=("parallel", "parallel"),  # shard over 2 TCs on v7x
            vmem_limit_bytes=cfg["vmem_limit"],
        ),
        cost_estimate=cost,
    )(*inputs)


# ----------------------------------------------------------------------------
# Parameters + forward pass
# ----------------------------------------------------------------------------
def init_params(key, key_size, query_size, value_size, num_hiddens):
    kq, kk, kv, ko = jax.random.split(key, 4)
    scale = 0.1
    # torch.nn.Linear weight shape is (out_features, in_features); stored as-is.
    return {
        "W_q": scale * jax.random.normal(kq, (num_hiddens, query_size), jnp.float32),
        "W_k": scale * jax.random.normal(kk, (num_hiddens, key_size), jnp.float32),
        "W_v": scale * jax.random.normal(kv, (num_hiddens, value_size), jnp.float32),
        "W_o": scale * jax.random.normal(ko, (num_hiddens, num_hiddens), jnp.float32),
    }


def multi_head_attention(params, queries, keys, values, valid_lens, num_heads,
                         mxu_dtype=jnp.bfloat16):
    B, Tq, Dq = queries.shape
    _, Tk, Dk = keys.shape
    _, _, Dv = values.shape
    H = params["W_q"].shape[0]
    assert H % num_heads == 0
    d = H // num_heads

    # y = x @ W.T ; weights pre-transposed once, 1/sqrt(d) folded into W_q in
    # f32, then cast to the bf16 MXU operand dtype (f32 accumulation in-kernel).
    # Under jit these prep ops are hoisted once per compilation.
    wq = (params["W_q"].T / math.sqrt(d)).astype(mxu_dtype)
    wk = params["W_k"].T.astype(mxu_dtype)
    wv = params["W_v"].T.astype(mxu_dtype)
    wo = params["W_o"].T.astype(mxu_dtype)

    # TODO(synk): for self-attention (queries is keys is values) the three
    # projections could be fused into one GEMM with a concatenated weight.
    q_proj = pallas_matmul(queries.reshape(B * Tq, Dq).astype(mxu_dtype), wq,
                           out_dtype=mxu_dtype).reshape(B, Tq, H)
    k_proj = pallas_matmul(keys.reshape(B * Tk, Dk).astype(mxu_dtype), wk,
                           out_dtype=mxu_dtype).reshape(B, Tk, H)
    v_proj = pallas_matmul(values.reshape(B * Tk, Dv).astype(mxu_dtype), wv,
                           out_dtype=mxu_dtype).reshape(B, Tk, H)

    if valid_lens is not None:
        vl = valid_lens.astype(jnp.int32)
    else:
        vl = jnp.full((B,), Tk, dtype=jnp.int32)

    # Fuse W_o into the attention epilogue when its double-buffered bf16 block
    # stays small (<= 8 MiB); otherwise fall back to a separate GEMM.
    fuse_wo = (2 * 2 * H * H) <= 8 * 1024 * 1024
    if fuse_wo:
        out = pallas_attention(q_proj, k_proj, v_proj, vl, wo, num_heads,
                               out_dtype=jnp.float32)
        return out
    attn = pallas_attention(q_proj, k_proj, v_proj, vl, None, num_heads,
                            out_dtype=mxu_dtype)
    out = pallas_matmul(attn.reshape(B * Tq, H), wo, out_dtype=jnp.float32)
    return out.reshape(B, Tq, H)


# ----------------------------------------------------------------------------
# Pure-JAX f32 reference (original transpose_qkv / transpose_output semantics).
# ----------------------------------------------------------------------------
def _transpose_qkv(x, num_heads):
    B, T, Hd = x.shape
    x = x.reshape(B, T, num_heads, Hd // num_heads)
    x = jnp.transpose(x, (0, 2, 1, 3))
    return x.reshape(B * num_heads, T, Hd // num_heads)


def _transpose_output(x, num_heads):
    BH, T, d = x.shape
    x = x.reshape(BH // num_heads, num_heads, T, d)
    x = jnp.transpose(x, (0, 2, 1, 3))
    return x.reshape(BH // num_heads, T, num_heads * d)


def reference_mha(params, queries, keys, values, valid_lens, num_heads):
    q = _transpose_qkv(queries @ params["W_q"].T, num_heads)
    k = _transpose_qkv(keys @ params["W_k"].T, num_heads)
    v = _transpose_qkv(values @ params["W_v"].T, num_heads)
    d = q.shape[-1]
    scores = jnp.einsum("bqd,bkd->bqk", q, k) / math.sqrt(d)
    if valid_lens is not None:
        vl = jnp.repeat(valid_lens.astype(jnp.int32), num_heads, axis=0)
        idx = jnp.arange(k.shape[1])[None, None, :]
        scores = jnp.where(idx < vl[:, None, None], scores, -1e6)
    p = jax.nn.softmax(scores, axis=-1)
    out = jnp.einsum("bqk,bkd->bqd", p, v)
    return _transpose_output(out, num_heads) @ params["W_o"].T


if __name__ == "__main__":
    key = jax.random.PRNGKey(0)
    k_params, k_q, k_k, k_v = jax.random.split(key, 4)

    B, Tq, Tk = 2, 8, 8
    query_size = key_size = value_size = 32
    num_hiddens, num_heads = 32, 4

    params = init_params(k_params, key_size, query_size, value_size, num_hiddens)
    queries = jax.random.normal(k_q, (B, Tq, query_size), jnp.float32)
    keys = jax.random.normal(k_k, (B, Tk, key_size), jnp.float32)
    values = jax.random.normal(k_v, (B, Tk, value_size), jnp.float32)
    valid_lens = jnp.array([3, 8], dtype=jnp.int32)

    fwd = jax.jit(functools.partial(multi_head_attention, num_heads=num_heads))

    # Masked (valid_lens) path.
    out = jax.block_until_ready(fwd(params, queries, keys, values, valid_lens))
    ref = reference_mha(params, queries, keys, values, valid_lens, num_heads)
    assert out.shape == (B, Tq, num_hiddens)
    # bf16 MXU operands (f32 accumulation) -> looser tolerance vs f32 reference.
    assert jnp.allclose(out, ref, atol=5e-2, rtol=5e-2), float(
        jnp.max(jnp.abs(out - ref)))

    # Unmasked (valid_lens=None) path.
    out_nm = jax.block_until_ready(fwd(params, queries, keys, values, None))
    ref_nm = reference_mha(params, queries, keys, values, None, num_heads)
    assert jnp.allclose(out_nm, ref_nm, atol=5e-2, rtol=5e-2), float(
        jnp.max(jnp.abs(out_nm - ref_nm)))

    print("KERNEL_OK")
</pallas_src>

<mosaic_0001>
module attributes {stable_mosaic.version = 11 : i64} {
  func.func @_matmul_kernel(%arg0: i32, %arg1: i32, %arg2: i32, %arg3: memref<16x32xbf16, #tpu.memory_space<vmem>>, %arg4: memref<32x32xbf16, #tpu.memory_space<vmem>>, %arg5: memref<16x32xbf16, #tpu.memory_space<vmem>>, %arg6: memref<16x32xf32, #tpu.memory_space<vmem>>) attributes {dimension_semantics = [#tpu.dimension_semantics<parallel>, #tpu.dimension_semantics<parallel>, #tpu.dimension_semantics<arbitrary>], iteration_bounds = array<i64: 1, 1, 1>, scalar_prefetch = 0 : i64, scratch_operands = 1 : i64, tpu.core_type = #tpu.core_type<tc>, window_params = [{transform_indices = @transform_0, window_bounds = array<i64: 16, 32>}, {transform_indices = @transform_1, window_bounds = array<i64: 32, 32>}, {transform_indices = @transform_2, window_bounds = array<i64: 16, 32>}]} {
    %c0_i32 = arith.constant 0 : i32
    %0 = arith.cmpi eq, %arg2, %c0_i32 : i32
    %1 = arith.extui %0 : i1 to i32
    %c0_i32_0 = arith.constant 0 : i32
    %2 = arith.cmpi ne, %1, %c0_i32_0 : i32
    scf.if %2 {
      %cst_10 = arith.constant 0.000000e+00 : f32
      %12 = vector.broadcast %cst_10 : f32 to vector<16x32xf32>
      %c0_11 = arith.constant 0 : index
      %c0_12 = arith.constant 0 : index
      %13 = vector.load %arg6[%c0_11, %c0_12] : memref<16x32xf32, #tpu.memory_space<vmem>>, vector<16x32xf32>
      tpu.vector_store %arg6[%c0_11, %c0_12], %12 {strides = array<i32>} : memref<16x32xf32, #tpu.memory_space<vmem>>, vector<16x32xf32>,
    } else {
    }
    %c0 = arith.constant 0 : index
    %c0_1 = arith.constant 0 : index
    %3 = vector.load %arg6[%c0, %c0_1] : memref<16x32xf32, #tpu.memory_space<vmem>>, vector<16x32xf32>
    %c0_2 = arith.constant 0 : index
    %c0_3 = arith.constant 0 : index
    %4 = vector.load %arg3[%c0_2, %c0_3] : memref<16x32xbf16, #tpu.memory_space<vmem>>, vector<16x32xbf16>
    %c0_4 = arith.constant 0 : index
    %c0_5 = arith.constant 0 : index
    %5 = vector.load %arg4[%c0_4, %c0_5] : memref<32x32xbf16, #tpu.memory_space<vmem>>, vector<32x32xbf16>
    %cst = arith.constant dense<0.000000e+00> : vector<16x32xf32>
    %6 = tpu.matmul %4, %5, %cst {dimension_numbers = #tpu.dot_dimension_numbers<[1], [0], [0], [1], [0, 0, 1, 1], [], []>} : vector<16x32xbf16>, vector<32x32xbf16>, vector<16x32xf32> -> vector<16x32xf32>
    %7 = arith.addf %3, %6 : vector<16x32xf32>
    %c0_6 = arith.constant 0 : index
    %c0_7 = arith.constant 0 : index
    %8 = vector.load %arg6[%c0_6, %c0_7] : memref<16x32xf32, #tpu.memory_space<vmem>>, vector<16x32xf32>
    tpu.vector_store %arg6[%c0_6, %c0_7], %7 {strides = array<i32>} : memref<16x32xf32, #tpu.memory_space<vmem>>, vector<16x32xf32>,
    %c0_i32_8 = arith.constant 0 : i32
    %9 = arith.cmpi eq, %arg2, %c0_i32_8 : i32
    %10 = arith.extui %9 : i1 to i32
    %c0_i32_9 = arith.constant 0 : i32
    %11 = arith.cmpi ne, %10, %c0_i32_9 : i32
    scf.if %11 {
      %c0_10 = arith.constant 0 : index
      %c0_11 = arith.constant 0 : index
      %12 = vector.load %arg6[%c0_10, %c0_11] : memref<16x32xf32, #tpu.memory_space<vmem>>, vector<16x32xf32>
      %13 = arith.truncf %12 : vector<16x32xf32> to vector<16x32xbf16>
      %c0_12 = arith.constant 0 : index
      %c0_13 = arith.constant 0 : index
      %14 = vector.load %arg5[%c0_12, %c0_13] : memref<16x32xbf16, #tpu.memory_space<vmem>>, vector<16x32xbf16>
      tpu.vector_store %arg5[%c0_12, %c0_13], %13 {strides = array<i32>} : memref<16x32xbf16, #tpu.memory_space<vmem>>, vector<16x32xbf16>,
    } else {
    }
    return
  }
  func.func @transform_0(%arg0: i32, %arg1: i32, %arg2: i32) -> (i32, i32) {
    %c0_i32 = arith.constant 0 : i32
    return %arg0, %arg2 : i32, i32
  }
  func.func @transform_1(%arg0: i32, %arg1: i32, %arg2: i32) -> (i32, i32) {
    %c0_i32 = arith.constant 0 : i32
    return %arg2, %arg1 : i32, i32
  }
  func.func @transform_2(%arg0: i32, %arg1: i32, %arg2: i32) -> (i32, i32) {
    %c0_i32 = arith.constant 0 : i32
    return %arg0, %arg1 : i32, i32
  }
}

module attributes {stable_mosaic.version = 11 : i64} {
  func.func @_mha_attention_kernel(%arg0: i32, %arg1: i32, %arg2: memref<2xi32, #tpu.memory_space<smem>>, %arg3: memref<1x8x32xbf16, #tpu.memory_space<vmem>>, %arg4: memref<1x8x32xbf16, #tpu.memory_space<vmem>>, %arg5: memref<1x8x32xbf16, #tpu.memory_space<vmem>>, %arg6: memref<32x32xbf16, #tpu.memory_space<vmem>>, %arg7: memref<1x8x32xf32, #tpu.memory_space<vmem>>, %arg8: memref<8x32xf32, #tpu.memory_space<vmem>>) attributes {dimension_semantics = [#tpu.dimension_semantics<parallel>, #tpu.dimension_semantics<parallel>], iteration_bounds = array<i64: 2, 1>, scalar_prefetch = 1 : i64, scratch_operands = 1 : i64, tpu.core_type = #tpu.core_type<tc>, window_params = [{transform_indices = @transform_0, window_bounds = array<i64: 1, 8, 32>}, {transform_indices = @transform_1, window_bounds = array<i64: 1, 8, 32>}, {transform_indices = @transform_2, window_bounds = array<i64: 1, 8, 32>}, {pipeline_mode = #tpu.pipeline_mode<synchronous>, transform_indices = @transform_3, window_bounds = array<i64: 32, 32>}, {transform_indices = @transform_4, window_bounds = array<i64: 1, 8, 32>}]} {
    %0 = arith.index_cast %arg0 : i32 to index
    %1 = memref.load %arg2[%0] : memref<2xi32, #tpu.memory_space<smem>>
    %c0 = arith.constant 0 : index
    %c0_0 = arith.constant 0 : index
    %c0_1 = arith.constant 0 : index
    %2 = vector.load %arg3[%c0, %c0_0, %c0_1] : memref<1x8x32xbf16, #tpu.memory_space<vmem>>, vector<1x8x32xbf16>
    %3 = vector.shape_cast %2 : vector<1x8x32xbf16> to vector<8x32xbf16>
    %c0_2 = arith.constant 0 : index
    %c0_3 = arith.constant 0 : index
    %c0_4 = arith.constant 0 : index
    %4 = vector.load %arg4[%c0_2, %c0_3, %c0_4] : memref<1x8x32xbf16, #tpu.memory_space<vmem>>, vector<1x8x32xbf16>
    %5 = vector.shape_cast %4 : vector<1x8x32xbf16> to vector<8x32xbf16>
    %c0_5 = arith.constant 0 : index
    %c0_6 = arith.constant 0 : index
    %c0_7 = arith.constant 0 : index
    %6 = vector.load %arg5[%c0_5, %c0_6, %c0_7] : memref<1x8x32xbf16, #tpu.memory_space<vmem>>, vector<1x8x32xbf16>
    %7 = vector.shape_cast %6 : vector<1x8x32xbf16> to vector<8x32xbf16>
    %8 = tpu.iota {dimensions = array<i32: 1>} : vector<8x8xi32>
    %9 = vector.broadcast %1 : i32 to vector<8x8xi32>
    %10 = arith.cmpi slt, %8, %9 : vector<8x8xi32>
    %11 = vector.extract_strided_slice %3 {offsets = [0, 0], sizes = [8, 8], strides = [1, 1]} : vector<8x32xbf16> to vector<8x8xbf16>
    %12 = vector.extract_strided_slice %5 {offsets = [0, 0], sizes = [8, 8], strides = [1, 1]} : vector<8x32xbf16> to vector<8x8xbf16>
    %cst = arith.constant dense<0.000000e+00> : vector<8x8xf32>
    %13 = tpu.matmul %11, %12, %cst {dimension_numbers = #tpu.dot_dimension_numbers<[1], [1], [0], [0], [0, 0, 1, 0], [], []>} : vector<8x8xbf16>, vector<8x8xbf16>, vector<8x8xf32> -> vector<8x8xf32>
    %cst_8 = arith.constant -1.000000e+06 : f32
    %14 = vector.broadcast %cst_8 : f32 to vector<8x8xf32>
    %15 = arith.select %10, %13, %14 : vector<8x8xi1>, vector<8x8xf32>
    %cst_9 = arith.constant dense<0xFF800000> : vector<8xf32>
    %16 = vector.multi_reduction <maximumf>, %15, %cst_9 [1] : vector<8x8xf32> to vector<8xf32>
    %17 = vector.shape_cast %16 : vector<8xf32> to vector<8x1xf32>
    %18 = vector.broadcast %17 : vector<8x1xf32> to vector<8x8xf32>
    %19 = arith.subf %15, %18 : vector<8x8xf32>
    %20 = math.exp %19 : vector<8x8xf32>
    %cst_10 = arith.constant dense<0.000000e+00> : vector<8xf32>
    %21 = vector.multi_reduction <add>, %20, %cst_10 [1] : vector<8x8xf32> to vector<8xf32>
    %22 = vector.shape_cast %21 : vector<8xf32> to vector<8x1xf32>
    %23 = tpu.reciprocal %22 {approx = true} : vector<8x1xf32> -> vector<8x1xf32>
    %24 = vector.broadcast %23 : vector<8x1xf32> to vector<8x8xf32>
    %25 = arith.mulf %20, %24 : vector<8x8xf32>
    %26 = arith.truncf %25 : vector<8x8xf32> to vector<8x8xbf16>
    %27 = vector.extract_strided_slice %7 {offsets = [0, 0], sizes = [8, 8], strides = [1, 1]} : vector<8x32xbf16> to vector<8x8xbf16>
    %cst_11 = arith.constant dense<0.000000e+00> : vector<8x8xf32>
    %28 = tpu.matmul %26, %27, %cst_11 {dimension_numbers = #tpu.dot_dimension_numbers<[1], [0], [0], [1], [0, 0, 1, 1], [], []>} : vector<8x8xbf16>, vector<8x8xbf16>, vector<8x8xf32> -> vector<8x8xf32>
    %c0_12 = arith.constant 0 : index
    %c0_13 = arith.constant 0 : index
    %29 = vector.load %arg8[%c0_12, %c0_13] : memref<8x32xf32, #tpu.memory_space<vmem>>, vector<8x8xf32>
    tpu.vector_store %arg8[%c0_12, %c0_13], %28 {strides = array<i32>} : memref<8x32xf32, #tpu.memory_space<vmem>>, vector<8x8xf32>,
    %30 = vector.extract_strided_slice %3 {offsets = [0, 8], sizes = [8, 8], strides = [1, 1]} : vector<8x32xbf16> to vector<8x8xbf16>
    %31 = vector.extract_strided_slice %5 {offsets = [0, 8], sizes = [8, 8], strides = [1, 1]} : vector<8x32xbf16> to vector<8x8xbf16>
    %cst_14 = arith.constant dense<0.000000e+00> : vector<8x8xf32>
    %32 = tpu.matmul %30, %31, %cst_14 {dimension_numbers = #tpu.dot_dimension_numbers<[1], [1], [0], [0], [0, 0, 1, 0], [], []>} : vector<8x8xbf16>, vector<8x8xbf16>, vector<8x8xf32> -> vector<8x8xf32>
    %cst_15 = arith.constant -1.000000e+06 : f32
    %33 = vector.broadcast %cst_15 : f32 to vector<8x8xf32>
    %34 = arith.select %10, %32, %33 : vector<8x8xi1>, vector<8x8xf32>
    %cst_16 = arith.constant dense<0xFF800000> : vector<8xf32>
    %35 = vector.multi_reduction <maximumf>, %34, %cst_16 [1] : vector<8x8xf32> to vector<8xf32>
    %36 = vector.shape_cast %35 : vector<8xf32> to vector<8x1xf32>
    %37 = vector.broadcast %36 : vector<8x1xf32> to vector<8x8xf32>
    %38 = arith.subf %34, %37 : vector<8x8xf32>
    %39 = math.exp %38 : vector<8x8xf32>
    %cst_17 = arith.constant dense<0.000000e+00> : vector<8xf32>
    %40 = vector.multi_reduction <add>, %39, %cst_17 [1] : vector<8x8xf32> to vector<8xf32>
    %41 = vector.shape_cast %40 : vector<8xf32> to vector<8x1xf32>
    %42 = tpu.reciprocal %41 {approx = true} : vector<8x1xf32> -> vector<8x1xf32>
    %43 = vector.broadcast %42 : vector<8x1xf32> to vector<8x8xf32>
    %44 = arith.mulf %39, %43 : vector<8x8xf32>
    %45 = arith.truncf %44 : vector<8x8xf32> to vector<8x8xbf16>
    %46 = vector.extract_strided_slice %7 {offsets = [0, 8], sizes = [8, 8], strides = [1, 1]} : vector<8x32xbf16> to vector<8x8xbf16>
    %cst_18 = arith.constant dense<0.000000e+00> : vector<8x8xf32>
    %47 = tpu.matmul %45, %46, %cst_18 {dimension_numbers = #tpu.dot_dimension_numbers<[1], [0], [0], [1], [0, 0, 1, 1], [], []>} : vector<8x8xbf16>, vector<8x8xbf16>, vector<8x8xf32> -> vector<8x8xf32>
    %c0_19 = arith.constant 0 : index
    %c8 = arith.constant 8 : index
    %48 = vector.load %arg8[%c0_19, %c8] : memref<8x32xf32, #tpu.memory_space<vmem>>, vector<8x8xf32>
    tpu.vector_store %arg8[%c0_19, %c8], %47 {strides = array<i32>} : memref<8x32xf32, #tpu.memory_space<vmem>>, vector<8x8xf32>,
    %49 = vector.extract_strided_slice %3 {offsets = [0, 16], sizes = [8, 8], strides = [1, 1]} : vector<8x32xbf16> to vector<8x8xbf16>
    %50 = vector.extract_strided_slice %5 {offsets = [0, 16], sizes = [8, 8], strides = [1, 1]} : vector<8x32xbf16> to vector<8x8xbf16>
    %cst_20 = arith.constant dense<0.000000e+00> : vector<8x8xf32>
    %51 = tpu.matmul %49, %50, %cst_20 {dimension_numbers = #tpu.dot_dimension_numbers<[1], [1], [0], [0], [0, 0, 1, 0], [], []>} : vector<8x8xbf16>, vector<8x8xbf16>, vector<8x8xf32> -> vector<8x8xf32>
    %cst_21 = arith.constant -1.000000e+06 : f32
    %52 = vector.broadcast %cst_21 : f32 to vector<8x8xf32>
    %53 = arith.select %10, %51, %52 : vector<8x8xi1>, vector<8x8xf32>
    %cst_22 = arith.constant dense<0xFF800000> : vector<8xf32>
    %54 = vector.multi_reduction <maximumf>, %53, %cst_22 [1] : vector<8x8xf32> to vector<8xf32>
    %55 = vector.shape_cast %54 : vector<8xf32> to vector<8x1xf32>
    %56 = vector.broadcast %55 : vector<8x1xf32> to vector<8x8xf32>
    %57 = arith.subf %53, %56 : vector<8x8xf32>
    %58 = math.exp %57 : vector<8x8xf32>
    %cst_23 = arith.constant dense<0.000000e+00> : vector<8xf32>
    %59 = vector.multi_reduction <add>, %58, %cst_23 [1] : vector<8x8xf32> to vector<8xf32>
    %60 = vector.shape_cast %59 : vector<8xf32> to vector<8x1xf32>
    %61 = tpu.reciprocal %60 {approx = true} : vector<8x1xf32> -> vector<8x1xf32>
    %62 = vector.broadcast %61 : vector<8x1xf32> to vector<8x8xf32>
    %63 = arith.mulf %58, %62 : vector<8x8xf32>
    %64 = arith.truncf %63 : vector<8x8xf32> to vector<8x8xbf16>
    %65 = vector.extract_strided_slice %7 {offsets = [0, 16], sizes = [8, 8], strides = [1, 1]} : vector<8x32xbf16> to vector<8x8xbf16>
    %cst_24 = arith.constant dense<0.000000e+00> : vector<8x8xf32>
    %66 = tpu.matmul %64, %65, %cst_24 {dimension_numbers = #tpu.dot_dimension_numbers<[1], [0], [0], [1], [0, 0, 1, 1], [], []>} : vector<8x8xbf16>, vector<8x8xbf16>, vector<8x8xf32> -> vector<8x8xf32>
    %c0_25 = arith.constant 0 : index
    %c16 = arith.constant 16 : index
    %67 = vector.load %arg8[%c0_25, %c16] : memref<8x32xf32, #tpu.memory_space<vmem>>, vector<8x8xf32>
    tpu.vector_store %arg8[%c0_25, %c16], %66 {strides = array<i32>} : memref<8x32xf32, #tpu.memory_space<vmem>>, vector<8x8xf32>,
    %68 = vector.extract_strided_slice %3 {offsets = [0, 24], sizes = [8, 8], strides = [1, 1]} : vector<8x32xbf16> to vector<8x8xbf16>
    %69 = vector.extract_strided_slice %5 {offsets = [0, 24], sizes = [8, 8], strides = [1, 1]} : vector<8x32xbf16> to vector<8x8xbf16>
    %cst_26 = arith.constant dense<0.000000e+00> : vector<8x8xf32>
    %70 = tpu.matmul %68, %69, %cst_26 {dimension_numbers = #tpu.dot_dimension_numbers<[1], [1], [0], [0], [0, 0, 1, 0], [], []>} : vector<8x8xbf16>, vector<8x8xbf16>, vector<8x8xf32> -> vector<8x8xf32>
    %cst_27 = arith.constant -1.000000e+06 : f32
    %71 = vector.broadcast %cst_27 : f32 to vector<8x8xf32>
    %72 = arith.select %10, %70, %71 : vector<8x8xi1>, vector<8x8xf32>
    %cst_28 = arith.constant dense<0xFF800000> : vector<8xf32>
    %73 = vector.multi_reduction <maximumf>, %72, %cst_28 [1] : vector<8x8xf32> to vector<8xf32>
    %74 = vector.shape_cast %73 : vector<8xf32> to vector<8x1xf32>
    %75 = vector.broadcast %74 : vector<8x1xf32> to vector<8x8xf32>
    %76 = arith.subf %72, %75 : vector<8x8xf32>
    %77 = math.exp %76 : vector<8x8xf32>
    %cst_29 = arith.constant dense<0.000000e+00> : vector<8xf32>
    %78 = vector.multi_reduction <add>, %77, %cst_29 [1] : vector<8x8xf32> to vector<8xf32>
    %79 = vector.shape_cast %78 : vector<8xf32> to vector<8x1xf32>
    %80 = tpu.reciprocal %79 {approx = true} : vector<8x1xf32> -> vector<8x1xf32>
    %81 = vector.broadcast %80 : vector<8x1xf32> to vector<8x8xf32>
    %82 = arith.mulf %77, %81 : vector<8x8xf32>
    %83 = arith.truncf %82 : vector<8x8xf32> to vector<8x8xbf16>
    %84 = vector.extract_strided_slice %7 {offsets = [0, 24], sizes = [8, 8], strides = [1, 1]} : vector<8x32xbf16> to vector<8x8xbf16>
    %cst_30 = arith.constant dense<0.000000e+00> : vector<8x8xf32>
    %85 = tpu.matmul %83, %84, %cst_30 {dimension_numbers = #tpu.dot_dimension_numbers<[1], [0], [0], [1], [0, 0, 1, 1], [], []>} : vector<8x8xbf16>, vector<8x8xbf16>, vector<8x8xf32> -> vector<8x8xf32>
    %c0_31 = arith.constant 0 : index
    %c24 = arith.constant 24 : index
    %86 = vector.load %arg8[%c0_31, %c24] : memref<8x32xf32, #tpu.memory_space<vmem>>, vector<8x8xf32>
    tpu.vector_store %arg8[%c0_31, %c24], %85 {strides = array<i32>} : memref<8x32xf32, #tpu.memory_space<vmem>>, vector<8x8xf32>,
    %c0_32 = arith.constant 0 : index
    %c0_33 = arith.constant 0 : index
    %87 = vector.load %arg8[%c0_32, %c0_33] : memref<8x32xf32, #tpu.memory_space<vmem>>, vector<8x32xf32>
    %88 = arith.truncf %87 : vector<8x32xf32> to vector<8x32xbf16>
    %c0_34 = arith.constant 0 : index
    %c0_35 = arith.constant 0 : index
    %89 = vector.load %arg6[%c0_34, %c0_35] : memref<32x32xbf16, #tpu.memory_space<vmem>>, vector<32x32xbf16>
    %cst_36 = arith.constant dense<0.000000e+00> : vector<8x32xf32>
    %90 = tpu.matmul %88, %89, %cst_36 {dimension_numbers = #tpu.dot_dimension_numbers<[1], [0], [0], [1], [0, 0, 1, 1], [], []>} : vector<8x32xbf16>, vector<32x32xbf16>, vector<8x32xf32> -> vector<8x32xf32>
    %c0_37 = arith.constant 0 : index
    %c0_38 = arith.constant 0 : index
    %c0_39 = arith.constant 0 : index
    %91 = vector.load %arg7[%c0_37, %c0_38, %c0_39] : memref<1x8x32xf32, #tpu.memory_space<vmem>>, vector<1x8x32xf32>
    %92 = vector.shape_cast %91 : vector<1x8x32xf32> to vector<8x32xf32>
    %93 = vector.shape_cast %90 : vector<8x32xf32> to vector<1x8x32xf32>
    tpu.vector_store %arg7[%c0_37, %c0_38, %c0_39], %93 {strides = array<i32>} : memref<1x8x32xf32, #tpu.memory_space<vmem>>, vector<1x8x32xf32>,
    return
  }
  func.func @transform_0(%arg0: i32, %arg1: i32, %arg2: memref<2xi32, #tpu.memory_space<smem>>) -> (i32, i32, i32) {
    %c0_i32 = arith.constant 0 : i32
    %c0_i32_0 = arith.constant 0 : i32
    return %arg0, %arg1, %c0_i32 : i32, i32, i32
  }
  func.func @transform_1(%arg0: i32, %arg1: i32, %arg2: memref<2xi32, #tpu.memory_space<smem>>) -> (i32, i32, i32) {
    %c0_i32 = arith.constant 0 : i32
    %c0_i32_0 = arith.constant 0 : i32
    %c0_i32_1 = arith.constant 0 : i32
    return %arg0, %c0_i32, %c0_i32_0 : i32, i32, i32
  }
  func.func @transform_2(%arg0: i32, %arg1: i32, %arg2: memref<2xi32, #tpu.memory_space<smem>>) -> (i32, i32, i32) {
    %c0_i32 = arith.constant 0 : i32
    %c0_i32_0 = arith.constant 0 : i32
    %c0_i32_1 = arith.constant 0 : i32
    return %arg0, %c0_i32, %c0_i32_0 : i32, i32, i32
  }
  func.func @transform_3(%arg0: i32, %arg1: i32, %arg2: memref<2xi32, #tpu.memory_space<smem>>) -> (i32, i32) {
    %c0_i32 = arith.constant 0 : i32
    %c0_i32_0 = arith.constant 0 : i32
    %c0_i32_1 = arith.constant 0 : i32
    return %c0_i32, %c0_i32_0 : i32, i32
  }
  func.func @transform_4(%arg0: i32, %arg1: i32, %arg2: memref<2xi32, #tpu.memory_space<smem>>) -> (i32, i32, i32) {
    %c0_i32 = arith.constant 0 : i32
    %c0_i32_0 = arith.constant 0 : i32
    return %arg0, %arg1, %c0_i32 : i32, i32, i32
  }
}

</mosaic_0001>

<bundles_post_ra>
// kernel: multi_head_attention.4
= control target key start
LH: loop header
LB: loop body
LE: loop exit
PB: predicated region body
PF: predicated region fallthrough
CT: control target
= control target key end

     0   :  { %vm16_vm0 = vcmask 261120   ;;  %v97_v1 = vmov 0.0   ;;  %vm73_vm1 = vcmask 257024   ;;  %s133_s1 = inlined_call_operand.vmem [shape: bf16[32,32], index: 1, kind: input, shape index: {}]   ;;  %s134_s0 = inlined_call_operand.vmem [shape: bf16[16,32], index: 0, kind: input, shape index: {}]   ;;  %s135_s2 = inlined_call_operand.vmem [shape: bf16[16,32], index: 2, kind: output, shape index: {}]  }
   0x1   :  { %v95_v0 = vld [vmem:[%s133_s1 + $0x8] sm:$0xff]  ;;  %17 = vst.msk [vmem:[#allocation2] sm:$0xff] %vm16_vm0, %v97_v1  ;;  %v94_v2 = vld [vmem:[%s133_s1] sm:$0xff] }
   0x2   :  { %18 = vst.msk [vmem:[#allocation2 + $0x8] sm:$0xff] %vm16_vm0, %v97_v1  ;;  %54 = vmatpush.bf16.msra.mxu0 %v95_v0  ;;  %v93_v3 = vld [vmem:[%s134_s0] sm:$0xff] }
   0x6   :  { %55 = vmatpush.bf16.msra.mxu0 %v94_v2 }
   0x8   :  { %v19_v4 = vld [vmem:[#allocation2] sm:$0xff] }
   0x9   :  { %92 = vmatmul.msk.bf16.vlgmr.msra.gmra.mxu0 %vm16_vm0, %v93_v3  ;;  %v20_v7 = vld [vmem:[#allocation2 + $0x8] sm:$0xff] }
  0x86   :  { %v57_v5 = vpop.f32.mrf.mxu0 }
  0x87   :  { %v62_v6 = vadd.f32 %v57_v5, %v19_v4 }
  0x89   :  { %64 = vst.msk [vmem:[#allocation2] sm:$0xff] %vm16_vm0, %v62_v6 }
  0x8e   :  { %v59_v8 = vpop.f32.mrf.mxu0 }
  0x8f   :  { %v63_v9 = vadd.f32 %v59_v8, %v20_v7 }
  0x90   :  { %v69_v10 = vld [vmem:[#allocation2] sm:$0xff] }
  0x91   :  { %v71_v11 = vpack.c.bf16 %v69_v10, %v69_v10  ;;  %65 = vst.msk [vmem:[#allocation2 + $0x8] sm:$0xff] %vm16_vm0, %v63_v9 }
  0x93   :  { %74 = vst.msk [vmem:[%s135_s2] sm:$0xf] %vm73_vm1, %v71_v11 }
  0x98   :  { %v70_v12 = vld [vmem:[#allocation2 + $0x8] sm:$0xff] }
  0x99   :  { %v72_v13 = vpack.c.bf16 %v70_v12, %v70_v12 }
  0x9b   :  { %75 = vst.msk [vmem:[%s135_s2 + $0x4] sm:$0xf] %vm73_vm1, %v72_v13 }

// kernel: multi_head_attention.7
= control target key start
LH: loop header
LB: loop body
LE: loop exit
PB: predicated region body
PF: predicated region fallthrough
CT: control target
= control target key end

     0   :  { %s874_s21 = smov [#allocation4]   ;;  %s1075_s0 = inlined_call_operand.vmem [shape: s32[2], index: 0, kind: input, shape index: {}]   ;;  %s1076_s1 = inlined_call_operand.vmem [shape: bf16[2,8,32], index: 1, kind: input, shape index: {}]   ;;  %s1077_s2 = inlined_call_operand.vmem [shape: bf16[2,8,32], index: 2, kind: input, shape index: {}]   ;;  %s1078_s3 = inlined_call_operand.vmem [shape: bf16[2,8,32], index: 3, kind: input, shape index: {}]   ;;  %s1079_s4 = inlined_call_operand.vmem [shape: bf16[32,32], index: 4, kind: input, shape index: {}]   ;;  %s1080_s5 = inlined_call_operand.hbm [shape: f32[2,8,32], index: 5, kind: output, shape index: {}]  }
   0x1   :  { %s11_s20 = sshll.u32 %s1075_s0, 4  ;;  %s12_s20 = int_to_ptr.vmem [resolvable:$true] %s11_s20 }
   0x2   :  { %14 = dma.vmem_to_smem %s12_s20, 16, %s874_s21, [#allocation3] }
   0x3   :  { %844 = dma.done.wait [#allocation3], 16 }
   0x4   :  { %845 = vsyncadd [#allocation3], 4294967280 }
   0x5   :  { %17 = sfence }
   0x6   :  { %18 = vsyncpa [#allocation6], 0 }
   0x7   :  { %20 = vsyncpa [#allocation6 + $0x1], 0  ;;  %s914_s22 = smov 0   ;;  %s916_s23 = smov 0  }
   0x8   :  { %s918_s24 = smov 0   ;;  %s920_s25 = smov 0  }
   0x9   :  { %s922_s26 = smov 0   ;;  %s924_s27 = smov 0  }
   0xa LB: > { %s670_s0 = sadd.s32 4294967295, %s872_s27   ;;  %s671_s28 = sadd.s32 4294967294, %s872_s27   ;;  %s872_s27 = sphi %s924_s27, %s26_s27   ;;  %s868_s26 = sphi %s922_s26, %s1089_s26   ;;  %s864_s25 = sphi %s920_s25, %s1088_s25   ;;  %s860_s24 = sphi %s918_s24, %s1087_s24   ;;  %s856_s23 = sphi %s916_s23, %s1086_s23   ;;  %s852_s22 = sphi %s914_s22, %s1085_s22  }
   0xb   : > { %s38_s29 = sadd.s32 1, %s868_s26  ;;  %s148_s30 = sadd.s32 1, %s860_s24 }
   0xc   : > { %p40_p0 = scmp.ge.s32.totalorder %s38_s29, 2  ;;  %p158_p1 = scmp.ne.s32.totalorder %s860_s24, %s856_s23 }
   0xd   : > { %p159_p2 = scmp.eq.s32.totalorder %s670_s0, 1  ;;  %p164_p3 = scmp.ne.s32.totalorder %s856_s23, %s852_s22 }
   0xe   : > { %s1091_s29 = smov (%p40_p0, %s38_s29), 0  ;;  %p165_p5 = scmp.eq.s32.totalorder %s671_s28, 1 }
   0xf   : > { %p954_p4 = por %p159_p2, %p158_p1  ;;  %s143_s7 = ssub.s32 %s868_s26, %s1091_s29 }
  0x10   : > { %p674_p6 = scmp.ge.s32.totalorder %s872_s27, 1  ;;  %p146_p7 = scmp.eq.s32.totalorder %s143_s7, 0 }
  0x11   : > { %p961_p8 = por %p165_p5, %p164_p3  ;;  %p210_p9 = scmp.lt.s32.totalorder %s872_s27, 3 }
  0x12   : > { %s967_s9 = scalar_select %p146_p7, %s860_s24, %s148_s30  }
  0x13   : > { %p211_p10 = pnand %p674_p6, %p210_p9 }
  0x14   : > { %p246_p11 = scmp.lt.s32.totalorder (!%p211_p10), %s864_s25, 1  ;;  %s875_s18 = smov (!%p211_p10), 112  }
  0x15   : > { %214 = sbr.rel (%p211_p10) target bundleno = 1235 (0x4d3), region = 36  ;;  %s876_s19 = smov (!%p211_p10), 104  }
  0x16   : > { %s262_s20 = sld [smem:[#allocation4 + %s864_s25]] (!%p211_p10)  ;;  %s877_s21 = smov (!%p211_p10), 120  }
  0x17   : > { %s878_s7 = smov (!%p211_p10), 8   ;;  %s243_s16 = sand.u32 (!%p211_p10), 1, %s856_s23  }
  0x18   : > { %s812_s13 = scalar_lea.hbm (!%p211_p10), %s1080_s5, 16 }
  0x1a   : > { %s247_s10 = scalar_select %p246_p11, %s864_s25, 1  ;;  %vm270_vm0 = vcmask 64512   ;;  %v266_v7 = vlaneseq  ;;  %vm306_vm2 = vcmask 1043456   ;;  %vm394_vm3 = vcmask 130112  }
  0x1b   : > { %vm457_vm4 = vcmask 195712   ;;  %vm520_vm5 = vcmask 261312   ;;  %vm540_vm6 = vcmask 261120  }
  0x1c   : > { %s971_s11 = sshll.u32 %s247_s10, 2  ;;  %v267_v8 = vand.u32 127, %v266_v7  ;;  %v268_v9 = vstv %s262_s20  ;;  %s879_s10 = smov 16  }
  0x1d   : > { %s256_s14 = scalar_lea.vmem %s1077_s2, %s971_s11  ;;  %s252_s17 = scalar_lea.vmem %s1076_s1, %s971_s11 }
  0x1e   : > { %v264_v0 = vld [vmem:[%s256_s14] sm:$0xf]  ;;  %vm988_vm1 = vcmp.lt.s32.totalorder %v267_v8, %v268_v9  ;;  %s260_s30 = scalar_lea.vmem %s1078_s3, %s971_s11  ;;  %s880_s11 = smov 24  }
  0x1f   : > { %v275_v1 = vsel %vm270_vm0, %v264_v0, 0  ;;  %v263_v2 = vld [vmem:[%s252_s17] sm:$0xf]  ;;  %v330_v3 = vunpack.c.l.b16 %v264_v0  ;;  %s697_s17 = sshll.u32 %s864_s25, 3 }
  0x20   : > { %284 = vmatpush.bf16.xpose.msra.mxu0 %v275_v1  ;;  %v325_v5 = vunpack.c.l.b16 %v263_v2  ;;  %v265_v25 = vld [vmem:[%s260_s30] sm:$0xf] }
  0x21   : > { %v331_v4 = vpack.c.b16 %v330_v3, %v330_v3  ;;  %v308_v26 = vsel %vm306_vm2, %v265_v25, 0  ;;  %v367_v49 = vunpack.c.l.b16 %v265_v25 }
  0x22   : > { %v326_v6 = vpack.c.b16 %v325_v5, %v325_v5  ;;  %317 = vmatpush.bf16.msra.mxu1 %v308_v26 }
  0x23   : > { %398 = vrot.lane.b32.xlu2 %v331_v4, %s875_s18  ;;  %v368_v50 = vpack.c.b16 %v367_v49, %v367_v49 }
  0x27   : > { %679 = vmatmul.msk.bf16.vlgmr.msra.gmra.mxu0 %vm270_vm0, %v263_v2 }
  0x2b   : > { %461 = vrot.lane.b32.xlu2 %v331_v4, %s876_s19 }
  0x33   : > { %396 = vrot.lane.b32.xlu2 %v326_v6, %s875_s18 }
  0x3b   : > { %459 = vrot.lane.b32.xlu2 %v326_v6, %s876_s19 }
  0x7d   : > { %v399_v15 = vpop.permute.xlu2 %398 }
  0x7e   : > { %v404_v27 = vsel %vm270_vm0, %v399_v15, 0 }
  0x7f   : > { %413 = vmatpush.bf16.xpose.msrb.mxu1 %v404_v27  ;;  %v701_v27 = vld [vmem:[%s1079_s4 + $0x8] sm:$0xff] }
  0x85   : > { %v462_v16 = vpop.permute.xlu2 %461 }
  0x86   : > { %v467_v21 = vsel %vm270_vm0, %v462_v16, 0 }
  0x87   : > { %476 = vmatpush.bf16.xpose.msrb.mxu0 %v467_v21 }
  0x8d   : > { %v397_v20 = vpop.permute.xlu2 %396 }
  0x95   : > { %v460_v24 = vpop.permute.xlu2 %459 }
  0x96   : > { %685 = vmatmul.msk.bf16.vlgmr.msrb.gmra.mxu0 %vm270_vm0, %v460_v24 }
  0xa4   : > { %v286_v11 = vpop.f32.mrf.mxu0 }
  0xa5   : > { %v290_v12 = vsel %vm988_vm1, %v286_v11, -1000000.0 }
  0xa6   : > { %v291_v13 = vsel %vm270_vm0, %v290_v12, -inf }
  0xa7   : > { %292 = vmax.xlane.f32.xlu0 %v291_v13 }
  0xac   : > { %v288_v14 = vpop.f32.mrf.mxu0 }
  0xbb   : > { %332 = vrot.lane.b32.xlu0 %v331_v4, %s877_s21 }
 0x113   : > { %v478_v34 = vpop.f32.mrf.mxu0 }
 0x114   : > { %v482_v35 = vsel %vm988_vm1, %v478_v34, -1000000.0 }
 0x115   : > { %v483_v36 = vsel %vm270_vm0, %v482_v35, -inf }
 0x11a   : > { %v293_v17 = vpop.xlane.xlu0 %292 }
 0x11b   : > { %v294_v18 = vsub.f32 %v290_v12, %v293_v17  ;;  %v480_v37 = vpop.f32.mrf.mxu0 }
 0x11d   : > { %v295_v19 = vmul.f32 1.442695, %v294_v18 }
 0x11f   : > { %764 = vpow2.f32 %v295_v19 }
 0x125   : > { %v765_v22 = vpop.eup %764 }
 0x126   : > { %v297_v23 = vsel %vm270_vm0, %v765_v22, 0.0 }
 0x127   : > { %298 = vadd.xlane.f32.xlu1 %v297_v23 }
 0x12d   : > { %v333_v28 = vpop.permute.xlu0 %332 }
 0x12e   : > { %v338_v29 = vsel %vm270_vm0, %v333_v28, 0  ;;  %v700_v28 = vld [vmem:[%s1079_s4] sm:$0xff] }
 0x12f   : > { %347 = vmatpush.bf16.xpose.msra.mxu2 %v338_v29 }
 0x140   : > { %327 = vrot.lane.b32.xlu1 %v326_v6, %s877_s21 }
 0x16a   : > { %484 = vmax.xlane.f32.xlu1 %v483_v36 }
 0x19a   : > { %v299_v30 = vpop.xlane.xlu1 %298 }
 0x19b   : > { %766 = vrcp.f32 %v299_v30 }
 0x1a1   : > { %v767_v31 = vpop.eup %766 }
 0x1a2   : > { %v301_v32 = vmul.f32 %v767_v31, %v765_v22 }
 0x1a4   : > { %v302_v33 = vpack.c.bf16 %v301_v32, %v301_v32 }
 0x1a6   : > { %680 = vmatmul.msk.bf16.vlgmr.msra.gmra.mxu1 %vm270_vm0, %v302_v33 }
 0x1a7   : > { %550 = vmatpush.bf16.msra.mxu1 %v701_v27 }
 0x1ab   : > { %551 = vmatpush.bf16.msra.mxu1 %v700_v28 }
 0x1b2   : > { %v328_v38 = vpop.permute.xlu1 %327 }
 0x1b3   : > { %681 = vmatmul.msk.bf16.vlgmr.msra.gmra.mxu2 %vm270_vm0, %v328_v38 }
 0x1b6   : > { %683 = vmatmul.msk.bf16.vlgmr.msrb.gmra.mxu1 %vm270_vm0, %v397_v20 }
 0x1dd   : > { %v485_v53 = vpop.xlane.xlu1 %484 }
 0x1de   : > { %v486_v57 = vsub.f32 %v482_v35, %v485_v53 }
 0x1e0   : > { %v487_v59 = vmul.f32 1.442695, %v486_v57 }
 0x223   : > { %v319_v39 = vpop.f32.mrf.mxu1 }
 0x224   : > { %323 = vst.msk [vmem:[#allocation2] sm:$0xff] %vm270_vm0, %v319_v39 }
 0x22b   : > { %v321_v40 = vpop.f32.mrf.mxu1 }
 0x233   : > { %v415_v41 = vpop.f32.mrf.mxu1 }
 0x234   : > { %v419_v42 = vsel %vm988_vm1, %v415_v41, -1000000.0 }
 0x235   : > { %v420_v43 = vsel %vm270_vm0, %v419_v42, -inf }
 0x236   : > { %421 = vmax.xlane.f32.xlu2 %v420_v43  ;;  %v349_v44 = vpop.f32.mrf.mxu2 }
 0x237   : > { %v353_v45 = vsel %vm988_vm1, %v349_v44, -1000000.0 }
 0x238   : > { %v354_v46 = vsel %vm270_vm0, %v353_v45, -inf }
 0x239   : > { %355 = vmax.xlane.f32.xlu0 %v354_v46 }
 0x23b   : > { %v417_v47 = vpop.f32.mrf.mxu1 }
 0x23e   : > { %v351_v48 = vpop.f32.mrf.mxu2 }
 0x24e   : > { %369 = vrot.lane.b32.xlu2 %v368_v50, %s877_s21  ;;  %s570_s21 = scalar_lea.hbm %s1080_s5, %s697_s17 }
 0x24f   : > { %s574_s30 = sshll.u32 %s570_s21, 4  ;;  %s575_s30 = int_to_ptr.hbm [resolvable:$true] %s574_s30 }
 0x2a9   : > { %v422_v51 = vpop.xlane.xlu2 %421 }
 0x2aa   : > { %v423_v52 = vsub.f32 %v419_v42, %v422_v51 }
 0x2ac   : > { %v424_v54 = vmul.f32 1.442695, %v423_v52  ;;  %v356_v55 = vpop.xlane.xlu0 %355 }
 0x2ad   : > { %v357_v56 = vsub.f32 %v353_v45, %v356_v55 }
 0x2ae   : > { %768 = vpow2.f32 %v424_v54 }
 0x2af   : > { %v358_v58 = vmul.f32 1.442695, %v357_v56 }
 0x2b1   : > { %770 = vpow2.f32 %v358_v58  ;;  %v370_v2 = vpop.permute.xlu2 %369 }
 0x2b2   : > { %772 = vpow2.f32 %v487_v59  ;;  %v375_v3 = vsel %vm306_vm2, %v370_v2, 0 }
 0x2b3   : > { %384 = vmatpush.bf16.msra.mxu3 %v375_v3 }
 0x2b4   : > { %v769_v60 = vpop.eup %768 }
 0x2b5   : > { %v426_v61 = vsel %vm270_vm0, %v769_v60, 0.0 }
 0x2b6   : > { %427 = vadd.xlane.f32.xlu1 %v426_v61 }
 0x2b7   : > { %v771_v62 = vpop.eup %770 }
 0x2b8   : > { %v360_v63 = vsel %vm270_vm0, %v771_v62, 0.0  ;;  %v773_v0 = vpop.eup %772 }
 0x2b9   : > { %361 = vadd.xlane.f32.xlu0 %v360_v63  ;;  %v489_v1 = vsel %vm270_vm0, %v773_v0, 0.0 }
 0x2c1   : > { %490 = vadd.xlane.f32.xlu0 %v489_v1 }
 0x2cf   : > { %432 = vrot.lane.b32.xlu1 %v368_v50, %s875_s18  ;;  %s675_s18 = sshll.u32 %s243_s16, 3 }
 0x2d0   : > { %s245_s0 = scalar_lea.vmem [#allocation5], %s675_s18 }
 0x2d1   : > { %s572_s28 = sshll.u32 %s245_s0, 4  ;;  %s573_s28 = int_to_ptr.vmem [resolvable:$true] %s572_s28 }
 0x2d5   : > { %495 = vrot.lane.b32.xlu0 %v368_v50, %s876_s19 }
 0x329   : > { %v428_v7 = vpop.xlane.xlu1 %427 }
 0x32c   : > { %v362_v4 = vpop.xlane.xlu0 %361 }
 0x32d   : > { %774 = vrcp.f32 %v362_v4 }
 0x32e   : > { %776 = vrcp.f32 %v428_v7 }
 0x333   : > { %v775_v5 = vpop.eup %774 }
 0x334   : > { %v364_v6 = vmul.f32 %v775_v5, %v771_v62  ;;  %v491_v9 = vpop.xlane.xlu0 %490  ;;  %v777_v10 = vpop.eup %776 }
 0x335   : > { %778 = vrcp.f32 %v491_v9  ;;  %v430_v12 = vmul.f32 %v777_v10, %v769_v60 }
 0x336   : > { %v365_v8 = vpack.c.bf16 %v364_v6, %v364_v6 }
 0x337   : > { %v431_v16 = vpack.c.bf16 %v430_v12, %v430_v12 }
 0x338   : > { %682 = vmatmul.msk.bf16.vlgmr.msra.gmra.mxu3 %vm270_vm0, %v365_v8 }
 0x33b   : > { %v779_v14 = vpop.eup %778 }
 0x33c   : > { %v493_v15 = vmul.f32 %v779_v14, %v773_v0 }
 0x33e   : > { %v494_v19 = vpack.c.bf16 %v493_v15, %v493_v15 }
 0x341   : > { %v433_v11 = vpop.permute.xlu1 %432 }
 0x342   : > { %v438_v13 = vsel %vm306_vm2, %v433_v11, 0 }
 0x343   : > { %447 = vmatpush.bf16.msrb.mxu3 %v438_v13 }
 0x347   : > { %v496_v17 = vpop.permute.xlu0 %495 }
 0x348   : > { %684 = vmatmul.msk.bf16.vlgmr.msrb.gmra.mxu3 %vm270_vm0, %v431_v16  ;;  %v501_v18 = vsel %vm306_vm2, %v496_v17, 0 }
 0x349   : > { %510 = vmatpush.bf16.msrb.mxu2 %v501_v18 }
 0x34c   : > { %686 = vmatmul.msk.bf16.vlgmr.msrb.gmra.mxu2 %vm270_vm0, %v494_v19 }
 0x3bb   : > { %v386_v20 = vpop.f32.mrf.mxu3 }
 0x3bc   : > { %391 = vrot.lane.b32.xlu2 %v386_v20, %s878_s7  ;;  %s559_s7 = scalar_lea.sflag [#allocation6], %s243_s16 }
 0x3c3   : > { %v388_v21 = vpop.f32.mrf.mxu3 }
 0x3cb   : > { %v449_v22 = vpop.f32.mrf.mxu3 }
 0x3cc   : > { %454 = vrot.lane.b32.xlu2 %v449_v22, %s879_s10  ;;  %s806_s10 = sshra.s32 %s575_s30, 4  ;;  %s807_s10 = int_to_ptr.hbm [resolvable:$true] %s806_s10 }
 0x3cd   : > { %p813_p1 = scmp.lt.s32.totalorder %s807_s10, %s1080_s5 }
 0x3cf   : > { %v512_v23 = vpop.f32.mrf.mxu2 }
 0x3d0   : > { %517 = vrot.lane.b32.xlu0 %v512_v23, %s880_s11  ;;  %s808_s11 = scalar_lea.hbm %s807_s10, 8 }
 0x3d1   : > { %p809_p12 = scmp.ne.s32.totalorder %s807_s10, %s808_s11  ;;  %p814_p2 = scmp.lt.s32.totalorder %s812_s13, %s808_s11 }
 0x3d3   : > { %v451_v24 = vpop.f32.mrf.mxu3  ;;  %p810_p13 = pnand %p809_p12, %p954_p4  ;;  %p815_p3 = por %p814_p2, %p813_p1 }
 0x3d5   : > { %p811_p0 = pneg %p810_p13 }
 0x3d7   : > { %v514_v25 = vpop.f32.mrf.mxu2  ;;  %p816_p5 = pnand %p815_p3, %p811_p0 }
 0x416   : > { %v392_v26 = vpop.permute.xlu2 %391 }
 0x417   : > { %395 = vst.msk [vmem:[#allocation2] sm:$0xff] %vm394_vm3, %v392_v26 }
 0x426   : > { %v455_v29 = vpop.permute.xlu2 %454 }
 0x427   : > { %458 = vst.msk [vmem:[#allocation2] sm:$0xff] %vm457_vm4, %v455_v29 }
 0x442   : > { %v518_v30 = vpop.permute.xlu0 %517 }
 0x443   : > { %521 = vst.msk [vmem:[#allocation2] sm:$0xff] %vm520_vm5, %v518_v30 }
 0x44a   : > { %v522_v31 = vld [vmem:[#allocation2] sm:$0xff] }
 0x44b   : > { %v523_v32 = vpack.c.bf16 %v522_v31, %v522_v31 }
 0x44d   : > { %695 = vmatmul.msk.bf16.vlgmr.msra.gmra.mxu1 %vm540_vm6, %v523_v32 }
 0x4ca   : > { %v553_v33 = vpop.f32.mrf.mxu1 }
 0x4cb   : > { %557 = vst.msk [vmem:[%s245_s0] sm:$0xff] %vm540_vm6, %v553_v33 }
 0x4cc   : > { %819 = shalt.err (!%p816_p5)
}
 0x4cd   : > { %702 = dma.vmem_to_hbm [thread:$0]  (%p954_p4), %s573_s28, 128, %s575_s30, %s559_s7  }
 0x4d2   : > { %v555_v34 = vpop.f32.mrf.mxu1 }
 0x4d3 PF: > { %p708_p6 = scmp.ge.s32.totalorder %s872_s27, 2  ;;  %s586_s16 = sand.u32 1, %s852_s22  }
 0x4d4   : > { %s587_s17 = scalar_lea.sflag [#allocation6], %s586_s16 }
 0x4d5   : > { %p705_p7 = pnand %p708_p6, %p961_p8 }
 0x4d7   : > { %p706_p9 = pneg %p705_p7 }
 0x4d9   : > { %847 = dma.done.wait (%p706_p9), %s587_s17, 128  }
 0x4da   : > { %849 = vsyncadd (%p706_p9), %s587_s17, 4294967168  ;;  %s26_s27 = sadd.s32 1, %s872_s27   ;;  %s1085_s22 = smov %s856_s23 }
 0x4db   : > { %p23_p10 = scmp.ge.s32.totalorder %s26_s27, 4   ;;  %s1086_s23 = smov %s860_s24 }
 0x4dc   : > { %s1087_s24 = smov %s967_s9  ;;  %s1088_s25 = smov %s868_s26 }
 0x4dd   : > { %s1089_s26 = smov %s1091_s29  ;;  %25 = sbr.rel (!%p23_p10) target bundleno = 10 (0xa), region = 77 }
 0x4e2   :  { %593 = vsyncpa [#allocation6], 1 }
 0x4e3   :  { %595 = vsyncpa [#allocation6 + $0x1], 1 }

</bundles_post_ra>
